<compile_context>
chip_gen: v7x
topology: tpu7x:2x2x1
jax: 0.10.0
libtpu: 0.0.40
codegen_flags: <defaults>
</compile_context>

<pallas_src>
import functools
import numpy as np
import jax
import jax.numpy as jnp
from jax import lax
from jax.experimental import pallas as pl
from jax.experimental.pallas import tpu as pltpu


def _hgnn_kernel(num_loops, M, d, g_ref, p_ref, out_ref, xcat_ref):
    """One grid step = one group of G subgraphs, row-stacked into M = G*nj job rows.

    g_ref   : (1, 5*M, M)        per-group slab [xj_aug ; xw_aug ; A_cat_bd ; M_proc_bd]
    p_ref   : (2*M + 4*d + 8, d) shared parameter slab
    out_ref : (1, M, M)          readout slab (cols >= G*nw are zero padding)
    xcat_ref: (M, 3*d)           persistent VMEM scratch replacing per-round lane concat
    """
    f32 = jnp.float32
    W = M  # slab width == padded feature width == job rows per group

    # ---- shared parameter slab (static, 8-aligned row offsets) ----
    p = p_ref[...]
    w_ej = p[0:W]                                  # emb W (jobs), bias folded at row d_job_in
    w_ew = p[W:2 * W]                              # emb W (workers), bias folded at row d_wk_in
    w_cat = p[2 * W:2 * W + 3 * d]                 # (3d, d) = [W_precede ; W_next ; W_sage_self]
    w_ngh = p[2 * W + 3 * d:2 * W + 4 * d]         # (d, d)  SAGE neighbor weight
    b_loop = p[2 * W + 4 * d:2 * W + 4 * d + 1]    # (1, d)  b_precede + b_next + b_sage

    # ---- per-group graph slab ----
    slab = g_ref[0]
    o_xw, o_ac, o_mp = M, 2 * M, 4 * M
    xj_aug = slab[0:M]              # (M, W)   [xj | 1 | 0...]
    xw_aug = slab[o_xw:o_ac]        # (W, W)   [xw | 1 | 0...], zero rows >= G*nw
    a_cat = slab[o_ac:o_mp]         # (2M, M)  block-diag [A_precede ; A_next], pre-normalized
    m_proc = slab[o_mp:o_mp + M]    # (M, W)   block-diag mean-agg, zero cols >= G*nw

    # HeteroLinear embedding; biases ride along in the augmented ones column.
    hj = jnp.dot(xj_aug, w_ej, preferred_element_type=f32)   # (M, d)
    hw = jnp.dot(xw_aug, w_ew, preferred_element_type=f32)   # (W, d), rows >= G*nw are 0

    # SAGEConv 'mean' neighbor term + all per-round biases: loop-invariant.
    h_neigh = jnp.dot(m_proc, hw, preferred_element_type=f32)
    b_total = jnp.dot(h_neigh, w_ngh, preferred_element_type=f32) + b_loop

    # k rounds of HeteroGraphConv(aggregate='sum') on the 'job' destination
    # type: 2 MXU ops per round.  The [agg_p | agg_n | hj] lane concat is
    # replaced by three static-offset stores into a reused VMEM scratch.
    # TODO(synk): switch to lax.fori_loop(..., unroll=True) carrying hj if
    # num_loops grows beyond a handful of rounds (vreg pressure / code size).
    for _ in range(num_loops):
        agg = jnp.dot(a_cat, hj, preferred_element_type=f32)  # (2M, d)
        xcat_ref[:, 0:d] = agg[:M]
        xcat_ref[:, d:2 * d] = agg[M:]
        xcat_ref[:, 2 * d:3 * d] = hj
        hj = jnp.dot(xcat_ref[...], w_cat, preferred_element_type=f32) + b_total

    # dotProductPredictor: contract the feature axis of both operands directly
    # (MXU consumes hw as a transposed RHS; no XLU transpose).
    out_ref[0] = lax.dot_general(hj, hw,
                                 dimension_numbers=(((1,), (1,)), ((), ())),
                                 preferred_element_type=f32)
    # TODO(synk): cast hj/hw/a_cat/weights to bf16 (f32 accumulation) once the
    # MXU, not per-step overhead, becomes the binding slot; re-check tolerance.
    # TODO(synk): the useful readout is only G*nw lanes wide; re-layout to a
    # >=128-lane slab if the worker count ever grows to real size.


def hgnn_forward(params, xj, xw, a_p, a_n, m_proc, num_loops=2, graphs_per_block=2):
    """Batched forward. Graph tensors carry a leading subgraph axis of size B.

    B subgraphs are packed into NG = B / G grid steps of G graphs each: the
    batch is folded into the matmul M dimension via block-diagonal aggregation
    matrices, and all operands are packed into two slabs so each grid step
    issues ~3 DMAs instead of ~12.  G=2 keeps both v7x TensorCores busy; set
    graphs_per_block=B on v5e/v6e (single TC) for a single fat step.
    """
    f32 = jnp.float32
    B, nj, dji = xj.shape
    _, nw, dwi = xw.shape
    d = params["w_emb_job"].shape[1]

    G = max(1, min(graphs_per_block, B))
    assert B % G == 0, "batch must divide evenly into groups"
    NG = B // G
    M = G * nj            # job rows per group == slab width
    W = M
    Nw = G * nw           # worker rows per group
    assert W >= dji + 1 and W >= dwi + 1 and W >= Nw, \
        "group too small to host the packed slab; raise graphs_per_block"

    # ---- per-group graph slab: [xj_aug ; xw_aug ; A_cat_bd ; M_proc_bd] ----
    def group_block_diag(a):                        # (B, r, c) -> (NG, G*r, G*c)
        _, r, c = a.shape
        eye = jnp.eye(G, dtype=f32)
        return jnp.einsum("ngij,gh->ngihj", a.reshape(NG, G, r, c),
                          eye).reshape(NG, G * r, G * c)

    xj_g = xj.reshape(NG, M, dji)
    xw_g = xw.reshape(NG, Nw, dwi)
    xj_seg = jnp.concatenate(
        [xj_g, jnp.ones((NG, M, 1), f32), jnp.zeros((NG, M, W - dji - 1), f32)], axis=-1)
    xw_rows = jnp.concatenate(
        [xw_g, jnp.ones((NG, Nw, 1), f32), jnp.zeros((NG, Nw, W - dwi - 1), f32)], axis=-1)
    xw_seg = jnp.concatenate([xw_rows, jnp.zeros((NG, W - Nw, W), f32)], axis=1)
    a_cat_seg = jnp.concatenate([group_block_diag(a_p), group_block_diag(a_n)], axis=1)
    mp_seg = jnp.concatenate(
        [group_block_diag(m_proc), jnp.zeros((NG, M, W - Nw), f32)], axis=-1)
    graph_slab = jnp.concatenate([xj_seg, xw_seg, a_cat_seg, mp_seg], axis=1)  # (NG, 5M, W)

    # ---- shared parameter slab (width d, 8-aligned segment offsets) ----
    def pad_rows(x, rows):
        return jnp.concatenate([x, jnp.zeros((rows - x.shape[0], x.shape[1]), f32)], axis=0)

    w_ej_aug = pad_rows(jnp.concatenate([params["w_emb_job"], params["b_emb_job"]], 0), W)
    w_ew_aug = pad_rows(jnp.concatenate([params["w_emb_worker"], params["b_emb_worker"]], 0), W)
    w_cat = jnp.concatenate([params["w_precede"], params["w_next"],
                             params["w_sage_self"]], axis=0)                    # (3d, d)
    b_loop = params["b_precede"] + params["b_next"] + params["b_sage"]          # (1, d)
    param_slab = jnp.concatenate(
        [w_ej_aug, w_ew_aug, w_cat, params["w_sage_neigh"], pad_rows(b_loop, 8)], axis=0)

    # TODO(synk): when nj grows, tile the dense A_cat along a K-reduction grid
    # axis ('arbitrary', f32 accumulator) and set vmem_limit_bytes per
    # generation — v7x has 64 MiB physical VMEM vs 128 MiB on v5e/v6e.
    kernel = functools.partial(_hgnn_kernel, num_loops, M, d)
    scores_full = pl.pallas_call(
        kernel,
        out_shape=jax.ShapeDtypeStruct((NG, M, W), jnp.float32),
        grid_spec=pltpu.PrefetchScalarGridSpec(
            num_scalar_prefetch=0,
            grid=(NG,),
            in_specs=[
                pl.BlockSpec((1, 5 * M, W), lambda i: (i, 0, 0)),    # per-group slab
                pl.BlockSpec(param_slab.shape, lambda i: (0, 0)),    # shared param slab
            ],
            out_specs=pl.BlockSpec((1, M, W), lambda i: (i, 0, 0)),
            scratch_shapes=[pltpu.VMEM((M, 3 * d), jnp.float32)],
        ),
        compiler_params=pltpu.CompilerParams(dimension_semantics=("parallel",)),
    )(graph_slab, param_slab)

    # Per-graph (nj, nw) readout blocks live on the block diagonal of each
    # group's (M, W) score slab.
    blocks = [scores_full[:, g * nj:(g + 1) * nj, g * nw:(g + 1) * nw] for g in range(G)]
    return jnp.stack(blocks, axis=1).reshape(B, nj, nw)


# -------------------- host-side glue (graph + params) --------------------

def build_graph(nj, nw, shift=0):
    """Deterministic synthetic FJSP-style graph (dense incidence, [dst, src])."""
    ap = np.zeros((nj, nj), np.float32)          # 'precede' job -> job
    for j in range(nj):
        ap[(j + 1 + shift) % nj, j] = 1.0
        ap[(j + 3 + shift) % nj, j] = 1.0
    an = ap.T.copy()                             # 'next' = reversed precedence
    proc = np.zeros((nj, nw), np.float32)        # 'processing' worker -> job
    for j in range(nj):
        for w in range(nw):
            if (j + w + shift) % 2 == 0:
                proc[j, w] = 1.0                 # every job has >=1 worker
    return ap, an, proc


def graphconv_norm(a):
    """DGL GraphConv norm='both' on dense adjacency a[dst, src]."""
    d_out = np.clip(a.sum(axis=0), 1.0, None)
    d_in = np.clip(a.sum(axis=1), 1.0, None)
    return ((d_in[:, None] ** -0.5) * a * (d_out[None, :] ** -0.5)).astype(np.float32)


def mean_agg(proc):
    """DGL SAGEConv 'mean' aggregation matrix (row-normalized incidence)."""
    deg = np.clip(proc.sum(axis=1, keepdims=True), 1.0, None)
    return (proc / deg).astype(np.float32)


def init_params(key, d_job_in=7, d_worker_in=3, d=16):
    ks = jax.random.split(key, 9)
    n = lambda k, s: (0.1 * jax.random.normal(k, s, jnp.float32))
    return {
        "w_emb_job":    n(ks[0], (d_job_in, d)),
        "b_emb_job":    n(ks[1], (1, d)),
        "w_emb_worker": n(ks[2], (d_worker_in, d)),
        "b_emb_worker": n(ks[3], (1, d)),
        "w_precede":    n(ks[4], (d, d)),
        "b_precede":    jnp.zeros((1, d), jnp.float32),
        "w_next":       n(ks[5], (d, d)),
        "b_next":       jnp.zeros((1, d), jnp.float32),
        "w_sage_self":  n(ks[6], (d, d)),
        "w_sage_neigh": n(ks[7], (d, d)),
        "b_sage":       jnp.zeros((1, d), jnp.float32),
    }


def hgnn_reference(params, xj, xw, ap, an, mproc, num_loops):
    """Un-fused single-graph reference (mirrors the torch module)."""
    hj = xj @ params["w_emb_job"] + params["b_emb_job"]
    hw = xw @ params["w_emb_worker"] + params["b_emb_worker"]
    for _ in range(num_loops):
        out_p = (ap @ hj) @ params["w_precede"] + params["b_precede"]
        out_n = (an @ hj) @ params["w_next"] + params["b_next"]
        out_s = (hj @ params["w_sage_self"]
                 + (mproc @ hw) @ params["w_sage_neigh"] + params["b_sage"])
        hj = out_p + out_n + out_s
    return hj @ hw.T


if __name__ == "__main__":
    # 4 subgraphs, 8 job nodes, 4 worker nodes each, embedding_dim=16, k=2
    B, nj, nw, d, k = 4, 8, 4, 16, 2

    key = jax.random.PRNGKey(0)
    k_feat_j, k_feat_w, k_params = jax.random.split(key, 3)
    xj = jax.random.normal(k_feat_j, (B, nj, 7), jnp.float32)   # g.ndata['hv']['job']
    xw = jax.random.normal(k_feat_w, (B, nw, 3), jnp.float32)   # g.ndata['he']['worker']
    params = init_params(k_params, d=d)

    ap_list, an_list, mp_list = [], [], []
    for b in range(B):
        ap_raw, an_raw, proc_raw = build_graph(nj, nw, shift=b)
        ap_list.append(graphconv_norm(ap_raw))
        an_list.append(graphconv_norm(an_raw))
        mp_list.append(mean_agg(proc_raw))
    a_p = jnp.asarray(np.stack(ap_list))
    a_n = jnp.asarray(np.stack(an_list))
    m_proc = jnp.asarray(np.stack(mp_list))

    scores = hgnn_forward(params, xj, xw, a_p, a_n, m_proc,
                          num_loops=k, graphs_per_block=2)
    scores = jax.block_until_ready(scores)

    for b in range(B):
        ref = hgnn_reference(params, xj[b], xw[b], a_p[b], a_n[b], m_proc[b],
                             num_loops=k)
        np.testing.assert_allclose(np.asarray(scores[b]), np.asarray(ref),
                                   rtol=1e-4, atol=1e-4)

    print("KERNEL_OK")
</pallas_src>

<mosaic_0001>
module attributes {stable_mosaic.version = 11 : i64} {
  func.func @_hgnn_kernel(%arg0: i32, %arg1: memref<1x80x16xf32, #tpu.memory_space<vmem>>, %arg2: memref<104x16xf32, #tpu.memory_space<vmem>>, %arg3: memref<1x16x16xf32, #tpu.memory_space<vmem>>, %arg4: memref<16x48xf32, #tpu.memory_space<vmem>>) attributes {dimension_semantics = [#tpu.dimension_semantics<parallel>], iteration_bounds = array<i64: 2>, scalar_prefetch = 0 : i64, scratch_operands = 1 : i64, tpu.core_type = #tpu.core_type<tc>, window_params = [{transform_indices = @transform_0, window_bounds = array<i64: 1, 80, 16>}, {pipeline_mode = #tpu.pipeline_mode<synchronous>, transform_indices = @transform_1, window_bounds = array<i64: 104, 16>}, {transform_indices = @transform_2, window_bounds = array<i64: 1, 16, 16>}]} {
    %c0 = arith.constant 0 : index
    %c0_0 = arith.constant 0 : index
    %0 = vector.load %arg2[%c0, %c0_0] : memref<104x16xf32, #tpu.memory_space<vmem>>, vector<104x16xf32>
    %1 = vector.extract_strided_slice %0 {offsets = [0, 0], sizes = [16, 16], strides = [1, 1]} : vector<104x16xf32> to vector<16x16xf32>
    %2 = vector.extract_strided_slice %0 {offsets = [16, 0], sizes = [16, 16], strides = [1, 1]} : vector<104x16xf32> to vector<16x16xf32>
    %3 = vector.extract_strided_slice %0 {offsets = [32, 0], sizes = [48, 16], strides = [1, 1]} : vector<104x16xf32> to vector<48x16xf32>
    %4 = vector.extract_strided_slice %0 {offsets = [80, 0], sizes = [16, 16], strides = [1, 1]} : vector<104x16xf32> to vector<16x16xf32>
    %5 = vector.extract_strided_slice %0 {offsets = [96, 0], sizes = [1, 16], strides = [1, 1]} : vector<104x16xf32> to vector<1x16xf32>
    %c0_1 = arith.constant 0 : index
    %c0_2 = arith.constant 0 : index
    %c0_3 = arith.constant 0 : index
    %6 = vector.load %arg1[%c0_1, %c0_2, %c0_3] : memref<1x80x16xf32, #tpu.memory_space<vmem>>, vector<1x80x16xf32>
    %7 = vector.shape_cast %6 : vector<1x80x16xf32> to vector<80x16xf32>
    %8 = vector.extract_strided_slice %7 {offsets = [0, 0], sizes = [16, 16], strides = [1, 1]} : vector<80x16xf32> to vector<16x16xf32>
    %9 = vector.extract_strided_slice %7 {offsets = [16, 0], sizes = [16, 16], strides = [1, 1]} : vector<80x16xf32> to vector<16x16xf32>
    %10 = vector.extract_strided_slice %7 {offsets = [32, 0], sizes = [32, 16], strides = [1, 1]} : vector<80x16xf32> to vector<32x16xf32>
    %11 = vector.extract_strided_slice %7 {offsets = [64, 0], sizes = [16, 16], strides = [1, 1]} : vector<80x16xf32> to vector<16x16xf32>
    %cst = arith.constant dense<0.000000e+00> : vector<16x16xf32>
    %12 = tpu.matmul %8, %1, %cst {dimension_numbers = #tpu.dot_dimension_numbers<[1], [0], [0], [1], [0, 0, 1, 1], [], []>} : vector<16x16xf32>, vector<16x16xf32>, vector<16x16xf32> -> vector<16x16xf32>
    %cst_4 = arith.constant dense<0.000000e+00> : vector<16x16xf32>
    %13 = tpu.matmul %9, %2, %cst_4 {dimension_numbers = #tpu.dot_dimension_numbers<[1], [0], [0], [1], [0, 0, 1, 1], [], []>} : vector<16x16xf32>, vector<16x16xf32>, vector<16x16xf32> -> vector<16x16xf32>
    %cst_5 = arith.constant dense<0.000000e+00> : vector<16x16xf32>
    %14 = tpu.matmul %11, %13, %cst_5 {dimension_numbers = #tpu.dot_dimension_numbers<[1], [0], [0], [1], [0, 0, 1, 1], [], []>} : vector<16x16xf32>, vector<16x16xf32>, vector<16x16xf32> -> vector<16x16xf32>
    %cst_6 = arith.constant dense<0.000000e+00> : vector<16x16xf32>
    %15 = tpu.matmul %14, %4, %cst_6 {dimension_numbers = #tpu.dot_dimension_numbers<[1], [0], [0], [1], [0, 0, 1, 1], [], []>} : vector<16x16xf32>, vector<16x16xf32>, vector<16x16xf32> -> vector<16x16xf32>
    %16 = vector.broadcast %5 : vector<1x16xf32> to vector<16x16xf32>
    %17 = arith.addf %15, %16 : vector<16x16xf32>
    %cst_7 = arith.constant dense<0.000000e+00> : vector<32x16xf32>
    %18 = tpu.matmul %10, %12, %cst_7 {dimension_numbers = #tpu.dot_dimension_numbers<[1], [0], [0], [1], [0, 0, 1, 1], [], []>} : vector<32x16xf32>, vector<16x16xf32>, vector<32x16xf32> -> vector<32x16xf32>
    %19 = vector.extract_strided_slice %18 {offsets = [0, 0], sizes = [16, 16], strides = [1, 1]} : vector<32x16xf32> to vector<16x16xf32>
    %c0_8 = arith.constant 0 : index
    %c0_9 = arith.constant 0 : index
    %20 = vector.load %arg4[%c0_8, %c0_9] : memref<16x48xf32, #tpu.memory_space<vmem>>, vector<16x16xf32>
    tpu.vector_store %arg4[%c0_8, %c0_9], %19 {strides = array<i32>} : memref<16x48xf32, #tpu.memory_space<vmem>>, vector<16x16xf32>,
    %21 = vector.extract_strided_slice %18 {offsets = [16, 0], sizes = [16, 16], strides = [1, 1]} : vector<32x16xf32> to vector<16x16xf32>
    %c0_10 = arith.constant 0 : index
    %c16 = arith.constant 16 : index
    %22 = vector.load %arg4[%c0_10, %c16] : memref<16x48xf32, #tpu.memory_space<vmem>>, vector<16x16xf32>
    tpu.vector_store %arg4[%c0_10, %c16], %21 {strides = array<i32>} : memref<16x48xf32, #tpu.memory_space<vmem>>, vector<16x16xf32>,
    %c0_11 = arith.constant 0 : index
    %c32 = arith.constant 32 : index
    %23 = vector.load %arg4[%c0_11, %c32] : memref<16x48xf32, #tpu.memory_space<vmem>>, vector<16x16xf32>
    tpu.vector_store %arg4[%c0_11, %c32], %12 {strides = array<i32>} : memref<16x48xf32, #tpu.memory_space<vmem>>, vector<16x16xf32>,
    %c0_12 = arith.constant 0 : index
    %c0_13 = arith.constant 0 : index
    %24 = vector.load %arg4[%c0_12, %c0_13] : memref<16x48xf32, #tpu.memory_space<vmem>>, vector<16x48xf32>
    %cst_14 = arith.constant dense<0.000000e+00> : vector<16x16xf32>
    %25 = tpu.matmul %24, %3, %cst_14 {dimension_numbers = #tpu.dot_dimension_numbers<[1], [0], [0], [1], [0, 0, 1, 1], [], []>} : vector<16x48xf32>, vector<48x16xf32>, vector<16x16xf32> -> vector<16x16xf32>
    %26 = arith.addf %25, %17 : vector<16x16xf32>
    %cst_15 = arith.constant dense<0.000000e+00> : vector<32x16xf32>
    %27 = tpu.matmul %10, %26, %cst_15 {dimension_numbers = #tpu.dot_dimension_numbers<[1], [0], [0], [1], [0, 0, 1, 1], [], []>} : vector<32x16xf32>, vector<16x16xf32>, vector<32x16xf32> -> vector<32x16xf32>
    %28 = vector.extract_strided_slice %27 {offsets = [0, 0], sizes = [16, 16], strides = [1, 1]} : vector<32x16xf32> to vector<16x16xf32>
    %c0_16 = arith.constant 0 : index
    %c0_17 = arith.constant 0 : index
    %29 = vector.load %arg4[%c0_16, %c0_17] : memref<16x48xf32, #tpu.memory_space<vmem>>, vector<16x16xf32>
    tpu.vector_store %arg4[%c0_16, %c0_17], %28 {strides = array<i32>} : memref<16x48xf32, #tpu.memory_space<vmem>>, vector<16x16xf32>,
    %30 = vector.extract_strided_slice %27 {offsets = [16, 0], sizes = [16, 16], strides = [1, 1]} : vector<32x16xf32> to vector<16x16xf32>
    %c0_18 = arith.constant 0 : index
    %c16_19 = arith.constant 16 : index
    %31 = vector.load %arg4[%c0_18, %c16_19] : memref<16x48xf32, #tpu.memory_space<vmem>>, vector<16x16xf32>
    tpu.vector_store %arg4[%c0_18, %c16_19], %30 {strides = array<i32>} : memref<16x48xf32, #tpu.memory_space<vmem>>, vector<16x16xf32>,
    %c0_20 = arith.constant 0 : index
    %c32_21 = arith.constant 32 : index
    %32 = vector.load %arg4[%c0_20, %c32_21] : memref<16x48xf32, #tpu.memory_space<vmem>>, vector<16x16xf32>
    tpu.vector_store %arg4[%c0_20, %c32_21], %26 {strides = array<i32>} : memref<16x48xf32, #tpu.memory_space<vmem>>, vector<16x16xf32>,
    %c0_22 = arith.constant 0 : index
    %c0_23 = arith.constant 0 : index
    %33 = vector.load %arg4[%c0_22, %c0_23] : memref<16x48xf32, #tpu.memory_space<vmem>>, vector<16x48xf32>
    %cst_24 = arith.constant dense<0.000000e+00> : vector<16x16xf32>
    %34 = tpu.matmul %33, %3, %cst_24 {dimension_numbers = #tpu.dot_dimension_numbers<[1], [0], [0], [1], [0, 0, 1, 1], [], []>} : vector<16x48xf32>, vector<48x16xf32>, vector<16x16xf32> -> vector<16x16xf32>
    %35 = arith.addf %34, %17 : vector<16x16xf32>
    %cst_25 = arith.constant dense<0.000000e+00> : vector<16x16xf32>
    %36 = tpu.matmul %35, %13, %cst_25 {dimension_numbers = #tpu.dot_dimension_numbers<[1], [1], [0], [0], [0, 0, 1, 0], [], []>} : vector<16x16xf32>, vector<16x16xf32>, vector<16x16xf32> -> vector<16x16xf32>
    %c0_26 = arith.constant 0 : index
    %c0_27 = arith.constant 0 : index
    %c0_28 = arith.constant 0 : index
    %37 = vector.load %arg3[%c0_26, %c0_27, %c0_28] : memref<1x16x16xf32, #tpu.memory_space<vmem>>, vector<1x16x16xf32>
    %38 = vector.shape_cast %37 : vector<1x16x16xf32> to vector<16x16xf32>
    %39 = vector.shape_cast %36 : vector<16x16xf32> to vector<1x16x16xf32>
    tpu.vector_store %arg3[%c0_26, %c0_27, %c0_28], %39 {strides = array<i32>} : memref<1x16x16xf32, #tpu.memory_space<vmem>>, vector<1x16x16xf32>,
    return
  }
  func.func @transform_0(%arg0: i32) -> (i32, i32, i32) {
    %c0_i32 = arith.constant 0 : i32
    %c0_i32_0 = arith.constant 0 : i32
    %c0_i32_1 = arith.constant 0 : i32
    return %arg0, %c0_i32, %c0_i32_0 : i32, i32, i32
  }
  func.func @transform_1(%arg0: i32) -> (i32, i32) {
    %c0_i32 = arith.constant 0 : i32
    %c0_i32_0 = arith.constant 0 : i32
    %c0_i32_1 = arith.constant 0 : i32
    return %c0_i32, %c0_i32_0 : i32, i32
  }
  func.func @transform_2(%arg0: i32) -> (i32, i32, i32) {
    %c0_i32 = arith.constant 0 : i32
    %c0_i32_0 = arith.constant 0 : i32
    %c0_i32_1 = arith.constant 0 : i32
    return %arg0, %c0_i32, %c0_i32_0 : i32, i32, i32
  }
}

</mosaic_0001>

<bundles_post_ra>
// kernel: tpu_custom_call.1
= control target key start
LH: loop header
LB: loop body
LE: loop exit
PB: predicated region body
PF: predicated region fallthrough
CT: control target
= control target key end

     0   :  { %7 = vsyncpa [#allocation4], 0  ;;  %s1637_s0 = inlined_call_operand.vmem [shape: f32[2,80,16], index: 0, kind: input, shape index: {}]   ;;  %s1638_s1 = inlined_call_operand.vmem [shape: f32[104,16], index: 1, kind: input, shape index: {}]   ;;  %s1639_s2 = inlined_call_operand.hbm [shape: f32[2,16,16], index: 2, kind: output, shape index: {}]  }
   0x1   :  { %9 = vsyncpa [#allocation4 + $0x1], 0  ;;  %s1405_s9 = smov 0   ;;  %s1407_s10 = smov 0  }
   0x2   :  { %s1409_s11 = smov 0   ;;  %s1411_s12 = smov 0  }
   0x3 LB: > { %s1426_s13 = sadd.s32 4294967295, %s1383_s12   ;;  %s1054_s14 = sadd.s32 4294967294, %s1383_s12   ;;  %s1383_s12 = sphi %s1411_s12, %s1647_s12   ;;  %s1379_s11 = sphi %s1409_s11, %s1646_s11   ;;  %s1375_s10 = sphi %s1407_s10, %s1645_s10   ;;  %s1371_s9 = sphi %s1405_s9, %s1644_s9  }
   0x4   : > { %s1430_s15 = sadd.s32 1, %s1383_s12   ;;  %s69_s16 = sadd.s32 1, %s1379_s11 }
   0x5   : > { %s66_s17 = ssub.s32 %s1383_s12, %s1430_s15  ;;  %p79_p0 = scmp.ne.s32.totalorder %s1379_s11, %s1375_s10 }
   0x6   : > { %p67_p1 = scmp.eq.s32.totalorder %s66_s17, 0  ;;  %p80_p2 = scmp.eq.s32.totalorder %s1426_s13, 1 }
   0x7   : > { %p85_p3 = scmp.ne.s32.totalorder %s1375_s10, %s1371_s9  ;;  %p86_p4 = scmp.eq.s32.totalorder %s1054_s14, 1 }
   0x8   : > { %s1441_s18 = scalar_select %p67_p1, %s1379_s11, %s69_s16  }
   0x9   : > { %p1443_p5 = por %p80_p2, %p79_p0  ;;  %p1447_p6 = por %p86_p4, %p85_p3 }
   0xa   : > { %p1057_p7 = scmp.ge.s32.totalorder %s1383_s12, 1  ;;  %p115_p8 = scmp.lt.s32.totalorder %s1383_s12, 3 }
   0xc   : > { %p116_p9 = pnand %p1057_p7, %p115_p8 }
   0xd   : > { %v142_v0 = vld [vmem:[%s1638_s1] sm:$0xff] (!%p116_p9)  ;;  %v143_v1 = vld [vmem:[%s1638_s1 + $0x8] sm:$0xff] (!%p116_p9)  ;;  %v144_v2 = vld [vmem:[%s1638_s1 + $0x10] sm:$0xff] (!%p116_p9)  ;;  %p137_p10 = scmp.lt.s32.totalorder (!%p116_p9), %s1426_s13, 1  ;;  %vm165_vm0 = vcmask (!%p116_p9), 130048   ;;  %s1385_s16 = smov (!%p116_p9), 32   ;;  %v409_v49 = vlaneseq (!%p116_p9) }
   0xe   : > { %119 = sbr.rel (%p116_p9) target bundleno = 1606 (0x646), region = 28  ;;  %v1223_v3 = vpack.c.bf16 (!%p116_p9), %v143_v1, %v142_v0  ;;  %v145_v4 = vld [vmem:[%s1638_s1 + $0x18] sm:$0xff] (!%p116_p9)  ;;  %v152_v11 = vld [vmem:[%s1638_s1 + $0x50] sm:$0xff] (!%p116_p9)  ;;  %v146_v25 = vld [vmem:[%s1638_s1 + $0x20] sm:$0xff] (!%p116_p9)  ;;  %s1386_s4 = smov (!%p116_p9), 16   ;;  %vm601_vm2 = vcmask (!%p116_p9), 261248  }
   0xf   : > { %v1227_v5 = vpack.c.bf16 (!%p116_p9), %v145_v4, %v144_v2  ;;  %v153_v12 = vld [vmem:[%s1638_s1 + $0x58] sm:$0xff] (!%p116_p9)  ;;  %v147_v26 = vld [vmem:[%s1638_s1 + $0x28] sm:$0xff] (!%p116_p9)  ;;  %v148_v28 = vld [vmem:[%s1638_s1 + $0x30] sm:$0xff] (!%p116_p9)  ;;  %vm612_vm3 = vcmask (!%p116_p9), 392448   ;;  %vm617_vm4 = vcmask (!%p116_p9), 392192   ;;  %v410_v50 = vshrl.u32 (!%p116_p9), %v409_v49, 7 }
  0x10   : > { %1224 = vmatprep.subr.bf16.mxu0 (!%p116_p9), %v1223_v3  ;;  %v1235_v13 = vpack.c.bf16 (!%p116_p9), %v153_v12, %v152_v11  ;;  %v1520_v27 = vpack.c.bf16 (!%p116_p9), %v147_v26, %v146_v25  ;;  %v149_v29 = vld [vmem:[%s1638_s1 + $0x38] sm:$0xff] (!%p116_p9)  ;;  %v150_v33 = vld [vmem:[%s1638_s1 + $0x40] sm:$0xff] (!%p116_p9)  ;;  %v151_v34 = vld [vmem:[%s1638_s1 + $0x48] sm:$0xff] (!%p116_p9)  ;;  %s134_s7 = sand.u32 (!%p116_p9), 1, %s1375_s10   ;;  %s1089_s17 = sshll.u32 (!%p116_p9), %s1426_s13, 8 }
  0x11   : > { %1228 = vmatprep.subr.bf16.mxu1 (!%p116_p9), %v1227_v5  ;;  %1226 = vmatpush3.bf16.msra.mxu0 (!%p116_p9), %v1223_v3  ;;  %v1247_v32 = vpack.c.bf16 (!%p116_p9), %v149_v29, %v148_v28  ;;  %v1251_v37 = vpack.c.bf16 (!%p116_p9), %v151_v34, %v150_v33  ;;  %vm1543_vm1 = vmpackc.low (!%p116_p9), %vm165_vm0, %vm165_vm0  ;;  %v411_v51 = vsub.s32 (!%p116_p9), 0, %v410_v50  ;;  %v154_v52 = vld [vmem:[%s1638_s1 + $0x60] sm:$0xff] (!%p116_p9)  ;;  %s1058_s8 = sshll.u32 (!%p116_p9), %s134_s7, 4  ;;  %s1592_s23 = scalar_lea.hbm (!%p116_p9), %s1639_s2, %s1089_s17 }
  0x12   : > { %1230 = vmatpush3.bf16.msra.mxu1 (!%p116_p9), %v1227_v5  ;;  %s136_s14 = scalar_lea.vmem (!%p116_p9), [#allocation3], %s1058_s8  ;;  %s1596_s24 = scalar_lea.sflag (!%p116_p9), [#allocation4], %s134_s7 }
  0x13   : > { %1236 = vmatprep.subr.bf16.mxu1 (!%p116_p9), %v1235_v13  ;;  %v412_v53 = vrot.slane (!%p116_p9), %v154_v52, %v411_v51 }
  0x15   : > { %s138_s29 = scalar_select %p137_p10, %s1426_s13, 1 }
  0x16   : > { %s1387_s13 = smov [#allocation3]  }
  0x17   : > { %s1277_s30 = smul.u32 80, %s138_s29  ;;  %s1325_s26 = sshll.u32 %s1387_s13, 4  ;;  %s1326_s26 = int_to_ptr.vmem [resolvable:$false] %s1325_s26 }
  0x18   : > { %s1327_s27 = scalar_lea.vmem %s1326_s26, 512 }
  0x19   : > { %s1470_s5 = scalar_lea.vmem %s1637_s0, %s1277_s30 }
  0x1a   : > { %v155_v6 = vld [vmem:[%s1470_s5] sm:$0xff]  ;;  %v157_v7 = vld [vmem:[%s1470_s5 + $0x10] sm:$0xff]  ;;  %v156_v8 = vld [vmem:[%s1470_s5 + $0x8] sm:$0xff] }
  0x1b   : > { %1142 = vmatprep.mubr.msk.f32.mxu0 %vm165_vm0, %v155_v6  ;;  %1149 = vmatprep.mubr.msk.f32.mxu1 %vm165_vm0, %v157_v7  ;;  %v158_v9 = vld [vmem:[%s1470_s5 + $0x18] sm:$0xff]  ;;  %v163_v10 = vld [vmem:[%s1470_s5 + $0x40] sm:$0xff]  ;;  %v164_v20 = vld [vmem:[%s1470_s5 + $0x48] sm:$0xff] }
  0x1c   : > { %1143 = vmatmul.mubr.msk.f32.vlgmr.msra.gmra.mrb[0].mxu0 %vm165_vm0, %v156_v8  ;;  %1150 = vmatmul.mubr.msk.f32.vlgmr.msra.gmra.mrb[0].mxu1 %vm165_vm0, %v158_v9  ;;  %v159_v21 = vld [vmem:[%s1470_s5 + $0x20] sm:$0xff]  ;;  %v1499_v22 = vld [vmem:[%s1470_s5 + $0x28] sm:$0xff]  ;;  %v1502_v23 = vld [vmem:[%s1470_s5 + $0x30] sm:$0xff] }
  0x1d   : > { %1156 = vmatprep.mubr.msk.f32.mxu0 %vm165_vm0, %v163_v10  ;;  %1238 = vmatpush3.bf16.msra.mxu1 %v1235_v13  ;;  %v1509_v24 = vld [vmem:[%s1470_s5 + $0x38] sm:$0xff] }
  0x1e   : > { %1244 = vmatprep.subr.bf16.mxu1 %v1520_v27 }
  0xef   : > { %v1144_v14 = vpop.f32.mrb[0].mxu0  ;;  %v1151_v15 = vpop.f32.mrb[0].mxu1 }
  0xf0   : > { %v238_v16 = vpop.f32.mrb[1].mxu0  ;;  %v319_v17 = vpop.f32.mrb[1].mxu1 }
  0xf1   : > { %v1239_v18 = vpack.c.bf16 %v1144_v14, %v238_v16  ;;  %v1488_v19 = vpack.c.bf16 %v1151_v15, %v319_v17  ;;  %606 = vrot.lane.b32.xlu1 %v238_v16, %s1385_s16 }
  0xf3   : > { %1232 = vmatprep.subr.bf16.mxu0 %v1488_v19 }
  0xf4   : > { %1234 = vmatpush3.bf16.msra.mxu0 %v1488_v19 }
  0xf5   : > { %608 = vrot.lane.b32.xlu1 %v1144_v14, %s1385_s16  ;;  %1240 = vmatprep.subr.bf16.mxu0 %v1239_v18 }
  0xf7   : > { %1157 = vmatmul.mubr.msk.f32.vlgmr.msra.gmra.mrb[2].mxu0 %vm165_vm0, %v164_v20 }
  0xf8   : > { %1242 = vmatpush3.bf16.msra.mxu0 %v1239_v18  ;;  %1170 = vmatprep.mubr.msk.f32.mxu0 %vm165_vm0, %v159_v21 }
  0xfb   : > { %1171 = vmatmul.mubr.msk.f32.vlgmr.msra.gmra.mrb[4].mxu0 %vm165_vm0, %v1499_v22 }
  0xfc   : > { %1173 = vmatprep.mubr.msk.f32.mxu0 %vm165_vm0, %v1502_v23 }
  0xff   : > { %1174 = vmatmul.mubr.msk.f32.gmra.mrb[6].mxu0 %vm165_vm0, %v1509_v24 }
 0x100   : > { %1195 = vmatprep.mubr.msk.f32.mxu0 %vm165_vm0, %v159_v21 }
 0x163   : > { %v607_v41 = vpop.permute.xlu1 %606 }
 0x167   : > { %v609_v44 = vpop.permute.xlu1 %608 }
 0x1ca   : > { %v1158_v30 = vpop.f32.mrb[2].mxu0 }
 0x1cb   : > { %v400_v31 = vpop.f32.mrb[3].mxu0 }
 0x1cc   : > { %1163 = vmatprep.mubr.msk.f32.mxu1 %vm165_vm0, %v400_v31 }
 0x1cd   : > { %1164 = vmatmul.mubr.msk.f32.vlgmr.msra.gmra.mrb[2].mxu1 %vm165_vm0, %v1158_v30 }
 0x1ce   : > { %1246 = vmatpush3.bf16.msra.mxu1 %v1520_v27  ;;  %v1172_v35 = vpop.f32.mrb[4].mxu0 }
 0x1cf   : > { %592 = vst.msk [vmem:[#allocation2 + $0x8] sm:$0xff] %vm165_vm0, %v1172_v35  ;;  %v572_v36 = vpop.f32.mrb[5].mxu0  ;;  %1248 = vmatprep.subr.bf16.mxu1 %v1247_v32 }
 0x1d0   : > { %591 = vst.msk [vmem:[#allocation2] sm:$0xff] %vm165_vm0, %v572_v36 }
 0x1d2   : > { %1250 = vmatpush3.bf16.msra.mxu1 %v1247_v32  ;;  %v1175_v38 = vpop.f32.mrb[6].mxu0 }
 0x1d3   : > { %v582_v39 = vpop.f32.mrb[7].mxu0  ;;  %1252 = vmatprep.subr.bf16.mxu1 %v1251_v37 }
 0x1d4   : > { %595 = vrot.lane.b32.xlu0 %v582_v39, %s1386_s4 }
 0x1d6   : > { %1254 = vmatpush3.bf16.msra.mxu1 %v1251_v37 }
 0x1d7   : > { %1273 = vmatprep.subr.msk.bf16.mxu1 %vm1543_vm1, %v1488_v19 }
 0x1d8   : > { %597 = vrot.lane.b32.xlu0 %v1175_v38, %s1386_s4 }
 0x246   : > { %v596_v42 = vpop.permute.xlu0 %595 }
 0x247   : > { %602 = vst.msk [vmem:[#allocation2] sm:$0xff] %vm601_vm2, %v596_v42 }
 0x248   : > { %613 = vst.msk [vmem:[#allocation2] sm:$0xff] %vm612_vm3, %v607_v41 }
 0x24a   : > { %v598_v43 = vpop.permute.xlu0 %597 }
 0x24b   : > { %603 = vst.msk [vmem:[#allocation2 + $0x8] sm:$0xff] %vm601_vm2, %v598_v43 }
 0x24c   : > { %614 = vst.msk [vmem:[#allocation2 + $0x8] sm:$0xff] %vm612_vm3, %v609_v44 }
 0x24f   : > { %v615_v45 = vld [vmem:[#allocation2] sm:$0xff] }
 0x250   : > { %1188 = vmatprep.mubr.msk.f32.mxu1 %vm617_vm4, %v615_v45 }
 0x253   : > { %v616_v46 = vld [vmem:[#allocation2 + $0x8] sm:$0xff] }
 0x254   : > { %1189 = vmatmul.mubr.msk.f32.vlgmr.msra.gmra.mrb[4].mxu1 %vm617_vm4, %v616_v46 }
 0x255   : > { %1276 = vmatpush3.bf16.xpose.msk.msra.mxu1 %vm1543_vm1, %v1488_v19 }
 0x2a0   : > { %v1165_v47 = vpop.f32.mrb[2].mxu1 }
 0x2a1   : > { %v485_v48 = vpop.f32.mrb[3].mxu1  ;;  %v491_v54 = vadd.f32 %v1165_v47, %v412_v53 }
 0x2a2   : > { %v486_v55 = vadd.f32 %v485_v48, %v412_v53 }
 0x327   : > { %v1190_v56 = vpop.f32.mrb[4].mxu1 }
 0x328   : > { %v696_v57 = vadd.f32 %v1190_v56, %v491_v54  ;;  %v690_v58 = vpop.f32.mrb[5].mxu1 }
 0x329   : > { %v691_v59 = vadd.f32 %v690_v58, %v486_v55 }
 0x32b   : > { %v1255_v60 = vpack.c.bf16 %v696_v57, %v691_v59 }
 0x32d   : > { %1256 = vmatprep.subr.bf16.mxu0 %v1255_v60 }
 0x32e   : > { %1258 = vmatpush3.bf16.msra.mxu0 %v1255_v60 }
 0x32f   : > { %1260 = vmatprep.subr.bf16.mxu0 %v1520_v27 }
 0x331   : > { %1196 = vmatmul.mubr.msk.f32.vlgmr.msra.gmra.mrb[8].mxu0 %vm165_vm0, %v1499_v22 }
 0x332   : > { %1198 = vmatprep.mubr.msk.f32.mxu0 %vm165_vm0, %v1502_v23  ;;  %1262 = vmatpush3.bf16.msra.mxu0 %v1520_v27 }
 0x333   : > { %1264 = vmatprep.subr.bf16.mxu0 %v1247_v32 }
 0x335   : > { %1199 = vmatmul.mubr.msk.f32.gmra.mrb[10].mxu0 %vm165_vm0, %v1509_v24 }
 0x336   : > { %1266 = vmatpush3.bf16.msra.mxu0 %v1247_v32 }
 0x337   : > { %1268 = vmatprep.subr.bf16.mxu0 %v1251_v37 }
 0x33a   : > { %1270 = vmatpush3.bf16.msra.mxu0 %v1251_v37 }
 0x404   : > { %v1197_v61 = vpop.f32.mrb[8].mxu0 }
 0x405   : > { %785 = vst.msk [vmem:[#allocation2 + $0x8] sm:$0xff] %vm165_vm0, %v1197_v61  ;;  %v765_v62 = vpop.f32.mrb[9].mxu0 }
 0x406   : > { %784 = vst.msk [vmem:[#allocation2] sm:$0xff] %vm165_vm0, %v765_v62 }
 0x408   : > { %v1200_v63 = vpop.f32.mrb[10].mxu0 }
 0x409   : > { %790 = vrot.lane.b32.xlu1 %v1200_v63, %s1386_s4  ;;  %v775_v0 = vpop.f32.mrb[11].mxu0 }
 0x40a   : > { %788 = vrot.lane.b32.xlu0 %v775_v0, %s1386_s4 }
 0x40d   : > { %800 = vrot.lane.b32.xlu1 %v696_v57, %s1385_s16 }
 0x40e   : > { %798 = vrot.lane.b32.xlu0 %v691_v59, %s1385_s16  ;;  %s992_s16 = sshll.u32 %s136_s14, 4  ;;  %s1587_s16 = int_to_ptr.vmem [resolvable:$true] %s992_s16 }
 0x40f   : > { %s1321_s25 = scalar_lea.vmem %s1587_s16, 256  ;;  %p1328_p0 = scmp.lt.s32.totalorder %s1587_s16, %s1326_s26 }
 0x410   : > { %p1322_p11 = scmp.ne.s32.totalorder %s1587_s16, %s1321_s25  ;;  %p1329_p1 = scmp.lt.s32.totalorder %s1327_s27, %s1321_s25 }
 0x412   : > { %p1323_p12 = pnand %p1322_p11, %p1443_p5  ;;  %p1330_p2 = por %p1329_p1, %p1328_p0 }
 0x414   : > { %p1324_p13 = pneg %p1323_p12 }
 0x416   : > { %p1331_p3 = pnand %p1330_p2, %p1324_p13 }
 0x47b   : > { %v791_v1 = vpop.permute.xlu1 %790 }
 0x47c   : > { %795 = vst.msk [vmem:[#allocation2 + $0x8] sm:$0xff] %vm601_vm2, %v791_v1  ;;  %v789_v2 = vpop.permute.xlu0 %788 }
 0x47d   : > { %794 = vst.msk [vmem:[#allocation2] sm:$0xff] %vm601_vm2, %v789_v2 }
 0x47f   : > { %v801_v3 = vpop.permute.xlu1 %800 }
 0x480   : > { %805 = vst.msk [vmem:[#allocation2 + $0x8] sm:$0xff] %vm612_vm3, %v801_v3  ;;  %v799_v4 = vpop.permute.xlu0 %798 }
 0x481   : > { %804 = vst.msk [vmem:[#allocation2] sm:$0xff] %vm612_vm3, %v799_v4 }
 0x487   : > { %v807_v6 = vld [vmem:[#allocation2 + $0x8] sm:$0xff] }
 0x488   : > { %v806_v5 = vld [vmem:[#allocation2] sm:$0xff] }
 0x489   : > { %1213 = vmatprep.mubr.msk.f32.mxu0 %vm617_vm4, %v806_v5 }
 0x48a   : > { %1214 = vmatmul.mubr.msk.f32.vlgmr.msra.gmra.mrb[12].mxu0 %vm617_vm4, %v807_v6 }
 0x55d   : > { %v1215_v7 = vpop.f32.mrb[12].mxu0 }
 0x55e   : > { %v880_v8 = vpop.f32.mrb[13].mxu0  ;;  %v886_v10 = vadd.f32 %v1215_v7, %v491_v54 }
 0x55f   : > { %v881_v9 = vadd.f32 %v880_v8, %v486_v55 }
 0x561   : > { %1220 = vmatprep.mubr.msk.f32.mxu1 %vm165_vm0, %v881_v9 }
 0x562   : > { %1221 = vmatmul.mubr.msk.f32.vlgmr.msra.gmra.mrb[6].mxu1 %vm165_vm0, %v886_v10 }
 0x635   : > { %v1222_v11 = vpop.f32.mrb[6].mxu1 }
 0x636   : > { %977 = vst.msk [vmem:[%s136_s14 + $0x8] sm:$0xff] %vm165_vm0, %v1222_v11  ;;  %v967_v12 = vpop.f32.mrb[7].mxu1 }
 0x637   : > { %976 = vst.msk [vmem:[%s136_s14] sm:$0xff] %vm165_vm0, %v967_v12 }
 0x638   : > { %1334 = shalt.err (!%p1331_p3)
}
 0x639   : > { %s1335_s28 = scalar_lea.hbm %s1592_s23, 256  ;;  %s1339_s3 = scalar_lea.hbm %s1639_s2, 512 }
 0x63a   : > { %p1336_p4 = scmp.ne.s32.totalorder %s1592_s23, %s1335_s28  ;;  %p1340_p9 = scmp.lt.u32.totalorder %s1592_s23, %s1639_s2 }
 0x63b   : > { %p1341_p10 = scmp.lt.u32.totalorder %s1339_s3, %s1335_s28  ;;  %p1343_p12 = scmp.lt.u32.totalorder %s1335_s28, %s1592_s23 }
 0x63c   : > { %p1337_p7 = pnand %p1336_p4, %p1443_p5 }
 0x63d   : > { %p1342_p11 = por %p1341_p10, %p1340_p9 }
 0x63e   : > { %p1338_p8 = pneg %p1337_p7 }
 0x63f   : > { %p1344_p13 = por %p1343_p12, %p1342_p11 }
 0x641   : > { %p1345_p0 = pnand %p1344_p13, %p1338_p8 }
 0x643   : > { %1348 = shalt.err (!%p1345_p0)
}
 0x644   : > { %s1388_s6 = smov 128   ;;  %s1389_s7 = smov 8  }
 0x645   : > { %1278 = dma.vmem_to_hbm [thread:$0]  (%p1443_p5), %s1587_s16, 256, %s1592_s23, %s1596_s24, %s1388_s6, %s1388_s6, %s1389_s7  }
 0x646 PF: > { %p1284_p1 = scmp.ge.s32.totalorder %s1383_s12, 2  ;;  %s1007_s8 = sand.u32 1, %s1371_s9  }
 0x647   : > { %s1008_s14 = scalar_lea.sflag [#allocation4], %s1007_s8 }
 0x648   : > { %p1281_p2 = pnand %p1284_p1, %p1447_p6 }
 0x64a   : > { %1366 = dma.done.wait (!%p1281_p2), %s1008_s14, 256  }
 0x64b   : > { %1368 = vsyncadd (!%p1281_p2), %s1008_s14, 4294967040  ;;  %p12_p3 = scmp.ge.s32.totalorder %s1430_s15, 4   ;;  %s1644_s9 = smov %s1375_s10 }
 0x64c   : > { %s1645_s10 = smov %s1379_s11  ;;  %s1646_s11 = smov %s1441_s18 }
 0x64d   : > { %s1647_s12 = smov %s1430_s15  ;;  %14 = sbr.rel (!%p12_p3) target bundleno = 3 (0x3), region = 63 }
 0x654   :  { %1013 = vsyncpa [#allocation4], 1 }
 0x655   :  { %1015 = vsyncpa [#allocation4 + $0x1], 1 }

</bundles_post_ra>
